<compile_context>
chip_gen: v5e
topology: v5e:2x2
jax: 0.10.0
libtpu: 0.0.40
codegen_flags: <defaults>
</compile_context>

<pallas_src>
import jax
import jax.numpy as jnp
from jax.experimental import pallas as pl
from jax.experimental.pallas import tpu as pltpu


def _round_up(x, m):
    return ((x + m - 1) // m) * m


def _cdiv(a, b):
    return -(-a // b)


def qnetwork_kernel(s_ref, a_ref, w1s_ref, w1a_ref, b1_ref,
                    w2_ref, b2_ref, w3_ref, b3_ref, o_ref):
    # f32 -> bf16 operand casts done in-kernel (free filler under the MXU).
    s = s_ref[...].astype(jnp.bfloat16)
    a = a_ref[...].astype(jnp.bfloat16)

    # layer1 (+ fused torch.cat via split weights): relu(s@W1s + a@W1a + b1).
    # f32 accumulation on the MXU, f32 bias/ReLU epilogue on the VPU.
    # TODO(synk): an in-kernel lane-concat of s|a against one [in_dim, H]
    # weight would halve the (already tiny) layer-1 MXU pushes; kept as two
    # dots for lowering robustness.
    h1 = (jnp.dot(s, w1s_ref[...], preferred_element_type=jnp.float32)
          + jnp.dot(a, w1a_ref[...], preferred_element_type=jnp.float32)
          + b1_ref[...])
    h1 = jnp.maximum(h1, 0.0)

    # layer2 + ReLU (bf16 MXU operands, f32 accumulate / epilogue).
    h2 = (jnp.dot(h1.astype(w2_ref.dtype), w2_ref[...],
                  preferred_element_type=jnp.float32)
          + b2_ref[...])
    h2 = jnp.maximum(h2, 0.0)

    # layer3 (out_features = 1), emitted LANE-DENSE: q[0, b] = sum_h h2[b,h]*w3[h].
    # w3 is stored as an (8, H) f32 buffer (rows 1..7 zero) so the dot has a
    # full sublane tile; h2.T is the natively-supported transposed-RHS matmul
    # pattern (same as q @ k.T in flash attention) and keeps batch on the lane
    # axis, avoiding a 1-lane masked store path entirely.
    q8 = jnp.dot(w3_ref[...], h2.T, preferred_element_type=jnp.float32)  # (8, tile_b)
    q_row = q8[0:1, :] + b3_ref[0, 0]            # (1, tile_b); b3 scalar from SMEM
    o_ref[...] = q_row.reshape(o_ref.shape).astype(o_ref.dtype)


def qnetwork_forward(state, action, params, *, tile_b_max=512):
    """state: [B, num_inputs] f32, action: [B, num_actions] f32 -> q: [B, 1] f32."""
    w1s, w1a, b1, w2, b2, w3_rows, b3 = params
    B, num_inputs = state.shape
    num_actions = action.shape[1]

    # ---- batch tiling ------------------------------------------------------
    #  * lane-dense output => 128-aligned tiles whenever there is more than one
    #    tile (unmasked stores); a single tile covers small batches.
    #  * >= 2 tiles whenever the batch allows so "parallel" can use both v7x TCs.
    #  * tile derived from B to avoid gross over-padding (pad <= one tile).
    B8 = _round_up(max(B, 1), 8)
    if B8 <= 128:
        tile_b, n_tiles = B8, 1
    else:
        n_tiles = max(_cdiv(B8, tile_b_max), 2)
        tile_b = _round_up(_cdiv(B8, n_tiles), 128)
        n_tiles = _cdiv(B8, tile_b)
    B_pad = n_tiles * tile_b

    if B_pad != B:
        pad = B_pad - B
        state = jnp.pad(state, ((0, pad), (0, 0)))
        action = jnp.pad(action, ((0, pad), (0, 0)))

    tiled = lambda cols: pl.BlockSpec((tile_b, cols), lambda i: (i, 0))
    resident = lambda arr: pl.BlockSpec(arr.shape, lambda i: (0, 0))
    # TODO(synk): at large hidden sizes, single-buffer the constant-index
    # weight blocks (pipeline_mode=pl.Buffered(1)) and/or set vmem_limit_bytes
    # explicitly; irrelevant at the sizes used here.

    out = pl.pallas_call(
        qnetwork_kernel,
        out_shape=jax.ShapeDtypeStruct((n_tiles, 1, tile_b), jnp.float32),
        grid=(n_tiles,),
        in_specs=[
            tiled(num_inputs),                                  # state tile (f32)
            tiled(num_actions),                                 # action tile (f32)
            resident(w1s),                                      # [num_inputs, H] bf16
            resident(w1a),                                      # [num_actions, H] bf16
            resident(b1),                                       # [1, H] f32
            resident(w2),                                       # [H, H] bf16
            resident(b2),                                       # [1, H] f32
            resident(w3_rows),                                  # [8, H] f32 (row 0 = w3)
            pl.BlockSpec(memory_space=pltpu.MemorySpace.SMEM),  # b3 scalar (1,1) f32
        ],
        out_specs=pl.BlockSpec((1, 1, tile_b), lambda i: (i, 0, 0)),
        compiler_params=pltpu.CompilerParams(
            dimension_semantics=("parallel",)),
    )(state, action, w1s, w1a, b1, w2, b2, w3_rows, b3)

    # (n_tiles, 1, tile_b) lane-dense tiles -> flat padded batch -> [B, 1].
    return out.reshape(-1)[:B].reshape(B, 1)


def init_qnetwork_params(key, num_inputs, num_actions, hidden_size, init_w=0.003):
    """Mirrors PyTorch defaults: uniform(-1/sqrt(fan_in)) for layer1/layer2,
    uniform(-init_w, init_w) for layer3.  The hidden dim is zero-padded to a
    multiple of 128 (full MXU/vreg lanes) -- exactly output-preserving since
    padded h1/h2 columns are relu(0 + 0) = 0 and padded w3 entries are 0.
    Layer1 is pre-split into state/action halves (fuses torch.cat); matmul
    weights are bf16, biases and the head stay f32."""
    in_dim = num_inputs + num_actions
    k1, k2, k3, k4, k5, k6 = jax.random.split(key, 6)

    def linear_default(kw, kb, fan_in, fan_out):
        bound = 1.0 / float(fan_in) ** 0.5
        w = jax.random.uniform(kw, (fan_in, fan_out), jnp.float32, -bound, bound)
        b = jax.random.uniform(kb, (1, fan_out), jnp.float32, -bound, bound)
        return w, b

    w1, b1 = linear_default(k1, k2, in_dim, hidden_size)
    w2, b2 = linear_default(k3, k4, hidden_size, hidden_size)
    w3 = jax.random.uniform(k5, (hidden_size, 1), jnp.float32, -init_w, init_w)
    b3 = jax.random.uniform(k6, (1, 1), jnp.float32, -init_w, init_w)

    H_pad = max(_round_up(hidden_size, 128), 128)
    if H_pad != hidden_size:
        ph = H_pad - hidden_size
        w1 = jnp.pad(w1, ((0, 0), (0, ph)))
        b1 = jnp.pad(b1, ((0, 0), (0, ph)))
        w2 = jnp.pad(w2, ((0, ph), (0, ph)))
        b2 = jnp.pad(b2, ((0, 0), (0, ph)))
        w3 = jnp.pad(w3, ((0, ph), (0, 0)))

    w1s = w1[:num_inputs].astype(jnp.bfloat16)        # [num_inputs, H_pad]
    w1a = w1[num_inputs:].astype(jnp.bfloat16)        # [num_actions, H_pad]
    w2 = w2.astype(jnp.bfloat16)                      # [H_pad, H_pad]
    w3_rows = jnp.pad(w3.T, ((0, 7), (0, 0)))         # [8, H_pad] f32, row 0 = w3
    return (w1s, w1a, b1, w2, b2, w3_rows, b3)


def reference_forward(state, action, params):
    """Pure-JAX reference mirroring the kernel's dtype strategy (bf16 MXU
    operands, f32 accumulation).  Note: deviates from a pure-f32 PyTorch
    QNetwork by ~bf16 matmul error."""
    w1s, w1a, b1, w2, b2, w3_rows, b3 = params
    s = state.astype(jnp.bfloat16)
    a = action.astype(jnp.bfloat16)
    h1 = jnp.maximum(
        jnp.dot(s, w1s, preferred_element_type=jnp.float32)
        + jnp.dot(a, w1a, preferred_element_type=jnp.float32) + b1, 0.0)
    h2 = jnp.maximum(
        jnp.dot(h1.astype(jnp.bfloat16), w2,
                preferred_element_type=jnp.float32) + b2, 0.0)
    return jnp.sum(h2 * w3_rows[0:1], axis=-1, keepdims=True) + b3


if __name__ == "__main__":
    num_inputs, num_actions, hidden_size = 8, 4, 32

    key = jax.random.PRNGKey(0)
    kp, kd = jax.random.split(key)
    params = init_qnetwork_params(kp, num_inputs, num_actions, hidden_size)

    # batch=2 exercises the single-tile path; batch=300 exercises the
    # multi-tile (grid >= 2) lane-dense path with boundary padding.
    for batch in (2, 300):
        ks, ka = jax.random.split(jax.random.fold_in(kd, batch))
        state = jax.random.normal(ks, (batch, num_inputs), jnp.float32)
        action = jax.random.normal(ka, (batch, num_actions), jnp.float32)

        q = qnetwork_forward(state, action, params)
        jax.block_until_ready(q)

        q_ref = reference_forward(state, action, params)
        assert q.shape == (batch, 1), q.shape
        max_err = float(jnp.max(jnp.abs(q - q_ref)))
        assert jnp.allclose(q, q_ref, atol=1e-4, rtol=1e-3), max_err

    print("KERNEL_OK")
</pallas_src>

<mosaic_0001>
module attributes {stable_mosaic.version = 11 : i64} {
  func.func @qnetwork_kernel(%arg0: i32, %arg1: memref<8x8xf32, #tpu.memory_space<vmem>>, %arg2: memref<8x4xf32, #tpu.memory_space<vmem>>, %arg3: memref<8x128xbf16, #tpu.memory_space<vmem>>, %arg4: memref<4x128xbf16, #tpu.memory_space<vmem>>, %arg5: memref<1x128xf32, #tpu.memory_space<vmem>>, %arg6: memref<128x128xbf16, #tpu.memory_space<vmem>>, %arg7: memref<1x128xf32, #tpu.memory_space<vmem>>, %arg8: memref<8x128xf32, #tpu.memory_space<vmem>>, %arg9: memref<1x1xf32, #tpu.memory_space<smem>>, %arg10: memref<1x1x8xf32, #tpu.memory_space<vmem>>) attributes {dimension_semantics = [#tpu.dimension_semantics<parallel>], iteration_bounds = array<i64: 1>, scalar_prefetch = 0 : i64, scratch_operands = 0 : i64, tpu.core_type = #tpu.core_type<tc>, window_params = [{transform_indices = @transform_0, window_bounds = array<i64: 8, 8>}, {transform_indices = @transform_1, window_bounds = array<i64: 8, 4>}, {pipeline_mode = #tpu.pipeline_mode<synchronous>, transform_indices = @transform_2, window_bounds = array<i64: 8, 128>}, {pipeline_mode = #tpu.pipeline_mode<synchronous>, transform_indices = @transform_3, window_bounds = array<i64: 4, 128>}, {pipeline_mode = #tpu.pipeline_mode<synchronous>, transform_indices = @transform_4, window_bounds = array<i64: 1, 128>}, {pipeline_mode = #tpu.pipeline_mode<synchronous>, transform_indices = @transform_5, window_bounds = array<i64: 128, 128>}, {pipeline_mode = #tpu.pipeline_mode<synchronous>, transform_indices = @transform_6, window_bounds = array<i64: 1, 128>}, {pipeline_mode = #tpu.pipeline_mode<synchronous>, transform_indices = @transform_7, window_bounds = array<i64: 8, 128>}, {transform_indices = @transform_8, window_bounds = array<i64: 1, 1>}, {transform_indices = @transform_9, window_bounds = array<i64: 1, 1, 8>}]} {
    %c0 = arith.constant 0 : index
    %c0_0 = arith.constant 0 : index
    %0 = vector.load %arg1[%c0, %c0_0] : memref<8x8xf32, #tpu.memory_space<vmem>>, vector<8x8xf32>
    %1 = arith.truncf %0 : vector<8x8xf32> to vector<8x8xbf16>
    %c0_1 = arith.constant 0 : index
    %c0_2 = arith.constant 0 : index
    %2 = vector.load %arg2[%c0_1, %c0_2] : memref<8x4xf32, #tpu.memory_space<vmem>>, vector<8x4xf32>
    %3 = arith.truncf %2 : vector<8x4xf32> to vector<8x4xbf16>
    %c0_3 = arith.constant 0 : index
    %c0_4 = arith.constant 0 : index
    %4 = vector.load %arg3[%c0_3, %c0_4] : memref<8x128xbf16, #tpu.memory_space<vmem>>, vector<8x128xbf16>
    %cst = arith.constant dense<0.000000e+00> : vector<8x128xf32>
    %5 = tpu.matmul %1, %4, %cst {dimension_numbers = #tpu.dot_dimension_numbers<[1], [0], [0], [1], [0, 0, 1, 1], [], []>} : vector<8x8xbf16>, vector<8x128xbf16>, vector<8x128xf32> -> vector<8x128xf32>
    %c0_5 = arith.constant 0 : index
    %c0_6 = arith.constant 0 : index
    %6 = vector.load %arg4[%c0_5, %c0_6] : memref<4x128xbf16, #tpu.memory_space<vmem>>, vector<4x128xbf16>
    %cst_7 = arith.constant dense<0.000000e+00> : vector<8x128xf32>
    %7 = tpu.matmul %3, %6, %cst_7 {dimension_numbers = #tpu.dot_dimension_numbers<[1], [0], [0], [1], [0, 0, 1, 1], [], []>} : vector<8x4xbf16>, vector<4x128xbf16>, vector<8x128xf32> -> vector<8x128xf32>
    %8 = arith.addf %5, %7 : vector<8x128xf32>
    %c0_8 = arith.constant 0 : index
    %c0_9 = arith.constant 0 : index
    %9 = vector.load %arg5[%c0_8, %c0_9] : memref<1x128xf32, #tpu.memory_space<vmem>>, vector<1x128xf32>
    %10 = vector.broadcast %9 : vector<1x128xf32> to vector<8x128xf32>
    %11 = arith.addf %8, %10 : vector<8x128xf32>
    %cst_10 = arith.constant 0.000000e+00 : f32
    %12 = vector.broadcast %cst_10 : f32 to vector<8x128xf32>
    %13 = arith.maximumf %11, %12 : vector<8x128xf32>
    %14 = arith.truncf %13 : vector<8x128xf32> to vector<8x128xbf16>
    %c0_11 = arith.constant 0 : index
    %c0_12 = arith.constant 0 : index
    %15 = vector.load %arg6[%c0_11, %c0_12] : memref<128x128xbf16, #tpu.memory_space<vmem>>, vector<128x128xbf16>
    %cst_13 = arith.constant dense<0.000000e+00> : vector<8x128xf32>
    %16 = tpu.matmul %14, %15, %cst_13 {dimension_numbers = #tpu.dot_dimension_numbers<[1], [0], [0], [1], [0, 0, 1, 1], [], []>} : vector<8x128xbf16>, vector<128x128xbf16>, vector<8x128xf32> -> vector<8x128xf32>
    %c0_14 = arith.constant 0 : index
    %c0_15 = arith.constant 0 : index
    %17 = vector.load %arg7[%c0_14, %c0_15] : memref<1x128xf32, #tpu.memory_space<vmem>>, vector<1x128xf32>
    %18 = vector.broadcast %17 : vector<1x128xf32> to vector<8x128xf32>
    %19 = arith.addf %16, %18 : vector<8x128xf32>
    %cst_16 = arith.constant 0.000000e+00 : f32
    %20 = vector.broadcast %cst_16 : f32 to vector<8x128xf32>
    %21 = arith.maximumf %19, %20 : vector<8x128xf32>
    %c0_17 = arith.constant 0 : index
    %c0_18 = arith.constant 0 : index
    %22 = vector.load %arg8[%c0_17, %c0_18] : memref<8x128xf32, #tpu.memory_space<vmem>>, vector<8x128xf32>
    %23 = tpu.transpose %21, [1, 0] : vector<8x128xf32> -> vector<128x8xf32>
    %cst_19 = arith.constant dense<0.000000e+00> : vector<8x8xf32>
    %24 = tpu.matmul %22, %23, %cst_19 {dimension_numbers = #tpu.dot_dimension_numbers<[1], [0], [0], [1], [0, 0, 1, 1], [], []>} : vector<8x128xf32>, vector<128x8xf32>, vector<8x8xf32> -> vector<8x8xf32>
    %25 = vector.extract_strided_slice %24 {offsets = [0, 0], sizes = [1, 8], strides = [1, 1]} : vector<8x8xf32> to vector<1x8xf32>
    %c0_20 = arith.constant 0 : index
    %c0_21 = arith.constant 0 : index
    %26 = memref.load %arg9[%c0_20, %c0_21] : memref<1x1xf32, #tpu.memory_space<smem>>
    %27 = vector.broadcast %26 : f32 to vector<1x8xf32>
    %28 = arith.addf %25, %27 : vector<1x8xf32>
    %29 = vector.shape_cast %28 : vector<1x8xf32> to vector<1x1x8xf32>
    %c0_22 = arith.constant 0 : index
    %c0_23 = arith.constant 0 : index
    %c0_24 = arith.constant 0 : index
    %30 = vector.load %arg10[%c0_22, %c0_23, %c0_24] : memref<1x1x8xf32, #tpu.memory_space<vmem>>, vector<1x1x8xf32>
    tpu.vector_store %arg10[%c0_22, %c0_23, %c0_24], %29 {strides = array<i32>} : memref<1x1x8xf32, #tpu.memory_space<vmem>>, vector<1x1x8xf32>,
    return
  }
  func.func @transform_0(%arg0: i32) -> (i32, i32) {
    %c0_i32 = arith.constant 0 : i32
    %c0_i32_0 = arith.constant 0 : i32
    return %arg0, %c0_i32 : i32, i32
  }
  func.func @transform_1(%arg0: i32) -> (i32, i32) {
    %c0_i32 = arith.constant 0 : i32
    %c0_i32_0 = arith.constant 0 : i32
    return %arg0, %c0_i32 : i32, i32
  }
  func.func @transform_2(%arg0: i32) -> (i32, i32) {
    %c0_i32 = arith.constant 0 : i32
    %c0_i32_0 = arith.constant 0 : i32
    %c0_i32_1 = arith.constant 0 : i32
    return %c0_i32, %c0_i32_0 : i32, i32
  }
  func.func @transform_3(%arg0: i32) -> (i32, i32) {
    %c0_i32 = arith.constant 0 : i32
    %c0_i32_0 = arith.constant 0 : i32
    %c0_i32_1 = arith.constant 0 : i32
    return %c0_i32, %c0_i32_0 : i32, i32
  }
  func.func @transform_4(%arg0: i32) -> (i32, i32) {
    %c0_i32 = arith.constant 0 : i32
    %c0_i32_0 = arith.constant 0 : i32
    %c0_i32_1 = arith.constant 0 : i32
    return %c0_i32, %c0_i32_0 : i32, i32
  }
  func.func @transform_5(%arg0: i32) -> (i32, i32) {
    %c0_i32 = arith.constant 0 : i32
    %c0_i32_0 = arith.constant 0 : i32
    %c0_i32_1 = arith.constant 0 : i32
    return %c0_i32, %c0_i32_0 : i32, i32
  }
  func.func @transform_6(%arg0: i32) -> (i32, i32) {
    %c0_i32 = arith.constant 0 : i32
    %c0_i32_0 = arith.constant 0 : i32
    %c0_i32_1 = arith.constant 0 : i32
    return %c0_i32, %c0_i32_0 : i32, i32
  }
  func.func @transform_7(%arg0: i32) -> (i32, i32) {
    %c0_i32 = arith.constant 0 : i32
    %c0_i32_0 = arith.constant 0 : i32
    %c0_i32_1 = arith.constant 0 : i32
    return %c0_i32, %c0_i32_0 : i32, i32
  }
  func.func @transform_8(%arg0: i32) -> (i32, i32) {
    %c0_i32 = arith.constant 0 : i32
    %c0_i32_0 = arith.constant 0 : i32
    %c0_i32_1 = arith.constant 0 : i32
    return %c0_i32, %c0_i32_0 : i32, i32
  }
  func.func @transform_9(%arg0: i32) -> (i32, i32, i32) {
    %c0_i32 = arith.constant 0 : i32
    %c0_i32_0 = arith.constant 0 : i32
    %c0_i32_1 = arith.constant 0 : i32
    return %arg0, %c0_i32, %c0_i32_0 : i32, i32, i32
  }
}

</mosaic_0001>

<bundles_post_ra>
// kernel: tpu_custom_call.1
= control target key start
LH: loop header
LB: loop body
LE: loop exit
PB: predicated region body
PF: predicated region fallthrough
CT: control target
= control target key end

     0   :  { %15 = vsyncpa [#allocation4], 0  ;;  %s497_s0 = inlined_call_operand.vmem [shape: f32[8,8], index: 0, kind: input, shape index: {}]   ;;  %s498_s1 = inlined_call_operand.vmem [shape: f32[8,4], index: 1, kind: input, shape index: {}]   ;;  %s499_s2 = inlined_call_operand.hbm [shape: bf16[8,128], index: 2, kind: input, shape index: {}]   ;;  %s500_s3 = inlined_call_operand.hbm [shape: bf16[4,128], index: 3, kind: input, shape index: {}]   ;;  %s501_s4 = inlined_call_operand.vmem [shape: f32[1,128], index: 4, kind: input, shape index: {}]   ;;  %s502_s5 = inlined_call_operand.hbm [shape: bf16[128,128], index: 5, kind: input, shape index: {}]   ;;  %s503_s6 = inlined_call_operand.vmem [shape: f32[1,128], index: 6, kind: input, shape index: {}]   ;;  %s504_s7 = inlined_call_operand.vmem [shape: f32[8,128], index: 7, kind: input, shape index: {}]   ;;  %s505_s8 = inlined_call_operand.<no memory space> [shape: f32[1,1], index: 8, kind: input, shape index: {}]   ;;  %s506_s9 = inlined_call_operand.hbm [shape: f32[1,1,8], index: 9, kind: output, shape index: {}]  }
   0x1   :  { %16 = vsyncpa [#allocation7], 0  ;;  %s38_s11 = sshll.u32 %s500_s3, 4  ;;  %s39_s11 = int_to_ptr.hbm [resolvable:$true] %s38_s11 }
   0x2   :  { %17 = vsyncpa [#allocation5], 0  ;;  %s411_s12 = smov [#allocation6]   ;;  %s27_s16 = sshll.u32 %s499_s2, 4  ;;  %s28_s16 = int_to_ptr.hbm [resolvable:$true] %s27_s16 }
   0x3   :  { %s40_s13 = sshll.u32 %s411_s12, 4  ;;  %s412_s17 = smov [#allocation3]   ;;  %s41_s13 = int_to_ptr.vmem [resolvable:$true] %s40_s13 }
   0x4   :  { %43 = dma.hbm_to_vmem [thread:$0]  %s39_s11, 32, %s41_s13, [#allocation7]  }
   0x5   :  { %s29_s18 = sshll.u32 %s412_s17, 4  ;;  %s50_s21 = sshll.u32 %s502_s5, 4  ;;  %s30_s18 = int_to_ptr.vmem [resolvable:$true] %s29_s18  ;;  %s51_s21 = int_to_ptr.hbm [resolvable:$true] %s50_s21 }
   0x6   :  { %32 = dma.hbm_to_vmem [thread:$0]  %s28_s16, 64, %s30_s18, [#allocation4]  }
   0x7   :  { %s413_s3 = smov [#allocation8]   ;;  %s414_s23 = smov 64  }
   0x8   :  { %s52_s22 = sshll.u32 %s413_s3, 4  ;;  %s415_s24 = smov 4   ;;  %s53_s22 = int_to_ptr.vmem [resolvable:$true] %s52_s22 }
   0x9   :  { %58 = dma.hbm_to_vmem [thread:$0]  %s51_s21, 1024, %s53_s22, [#allocation7], %s414_s23, %s414_s23, %s415_s24  }
   0xa   :  { %405 = dma.done.wait [#allocation4], 64  }
   0xb   :  { %406 = vsyncadd [#allocation4], 4294967232 }
   0xc   :  { %407 = dma.done.wait [#allocation7], 1056  }
   0xd   :  { %408 = vsyncadd [#allocation7], 4294966240  ;;  %vm88_vm0 = vcmask 1041408   ;;  %vm109_vm1 = vcmask 1043456   ;;  %v83_v0 = vld [vmem:[#allocation6] sm:$0x3]  ;;  %v237_v31 = vstv %s505_s8 }
   0xe   :  { %v82_v1 = vld [vmem:[#allocation3] sm:$0xf]  ;;  %v90_v3 = vsel %vm88_vm0, %v83_v0, 0  ;;  %vm84_vm2 = vcmask 31744   ;;  %vm105_vm3 = vcmask 64512   ;;  %v299_v9 = vld [vmem:[#allocation8 + $0x30] sm:$0xff] }
   0xf   :  { %v80_v2 = vld [vmem:[%s498_s1] sm:$0xff]  ;;  %v111_v4 = vsel %vm109_vm1, %v82_v1, 0  ;;  %99 = vmatpush.bf16.msra.mxu0 %v90_v3  ;;  %v298_v10 = vld [vmem:[#allocation8 + $0x28] sm:$0xff]  ;;  %v295_v13 = vld [vmem:[#allocation8 + $0x10] sm:$0xff]  ;;  %s416_s11 = smov [#allocation9]   ;;  %vm239_vm4 = vcmask 57344  }
  0x10   :  { %v81_v5 = vpack.c.bf16 %v80_v2, %v80_v2  ;;  %v78_v6 = vld [vmem:[%s497_s0] sm:$0xff]  ;;  %120 = vmatpush.bf16.msra.mxu1 %v111_v4  ;;  %v294_v14 = vld [vmem:[#allocation8 + $0x8] sm:$0xff]  ;;  %s246_s12 = sshll.u32 %s416_s11, 4  ;;  %s247_s12 = int_to_ptr.vmem [resolvable:$true] %s246_s12 }
  0x11   :  { %v300_v7 = vld [vmem:[#allocation8 + $0x38] sm:$0xff]  ;;  %v79_v8 = vpack.c.bf16 %v78_v6, %v78_v6  ;;  %v297_v11 = vld [vmem:[#allocation8 + $0x20] sm:$0xff] }
  0x12   :  { %201 = vmatpush.bf16.msra.mxu2 %v300_v7  ;;  %259 = vmatmul.msk.bf16.vlgmr.msra.gmra.mxu0 %vm84_vm2, %v81_v5  ;;  %v296_v12 = vld [vmem:[#allocation8 + $0x18] sm:$0xff]  ;;  %v293_v15 = vld [vmem:[#allocation8] sm:$0xff] }
  0x13   :  { %260 = vmatmul.msk.bf16.vlgmr.msra.gmra.mxu1 %vm105_vm3, %v79_v8  ;;  %v307_v16 = vld [vmem:[%s501_s4] ss:$0 sm:$0xff] }
  0x14   :  { %v308_v25 = vld [vmem:[%s503_s6] ss:$0 sm:$0xff]  ;;  %s248_s6 = sshll.u32 %s506_s9, 4  ;;  %s249_s6 = int_to_ptr.hbm [resolvable:$true] %s248_s6 }
  0x15   :  { %v215_v29 = vld [vmem:[%s504_s7] sm:$0xff] }
  0x16   :  { %202 = vmatpush.bf16.msra.mxu2 %v299_v9 }
  0x1a   :  { %203 = vmatpush.bf16.msra.mxu2 %v298_v10 }
  0x1e   :  { %204 = vmatpush.bf16.msra.mxu2 %v297_v11 }
  0x22   :  { %205 = vmatpush.bf16.msra.mxu2 %v296_v12 }
  0x26   :  { %206 = vmatpush.bf16.msra.mxu2 %v295_v13 }
  0x2a   :  { %207 = vmatpush.bf16.msra.mxu2 %v294_v14 }
  0x2e   :  { %208 = vmatpush.bf16.msra.mxu2 %v293_v15 }
  0x8f   :  { %v101_v17 = vpop.f32.mrf.mxu0 }
  0x90   :  { %v122_v18 = vpop.f32.mrf.mxu1 }
  0x91   :  { %v123_v19 = vadd.f32 %v122_v18, %v101_v17 }
  0x93   :  { %v130_v20 = vadd.f32 %v307_v16, %v123_v19 }
  0x95   :  { %v131_v21 = vmax.f32 %v130_v20, 0.0 }
  0x97   :  { %v132_v22 = vpack.c.bf16 %v131_v21, %v131_v21  ;;  %v103_v23 = vpop.f32.mrf.mxu0 }
  0x98   :  { %v124_v24 = vpop.f32.mrf.mxu1 }
  0x99   :  { %209 = vmatmul.bf16.vlgmr.msra.gmra.mxu2 %v132_v22 }
 0x11c   :  { %v210_v26 = vpop.f32.mrf.mxu2 }
 0x11d   :  { %v211_v27 = vadd.f32 %v308_v25, %v210_v26 }
 0x11f   :  { %v214_v28 = vmax.f32 %v211_v27, 0.0 }
 0x121   :  { %231 = vmatpush.xpose.msra.mxu3 %v214_v28 }
 0x124   :  { %v212_v30 = vpop.f32.mrf.mxu2  ;;  %232 = vmatmul.f32.vlgmr.msra.gmra.mxu3 %v215_v29 }
 0x1a7   :  { %v233_v32 = vpop.f32.mrf.mxu3 }
 0x1a8   :  { %v238_v33 = vadd.f32 %v237_v31, %v233_v32 }
 0x1aa   :  { %240 = vst.msk [vmem:[#allocation9] sm:$0x1] %vm239_vm4, %v238_v33 }
 0x1ab   :  { %251 = dma.vmem_to_hbm [thread:$0]  %s247_s12, 16, %s249_s6, [#allocation5]  }
 0x1ac   :  { %409 = dma.done.wait [#allocation5], 16  }
 0x1ad   :  { %410 = vsyncadd [#allocation5], 4294967280 }
 0x1ae   :  { %256 = vsyncpa [#allocation4], 1 }
 0x1af   :  { %257 = vsyncpa [#allocation7], 1 }
 0x1b0   :  { %258 = vsyncpa [#allocation5], 1 }

</bundles_post_ra>
